<compile_context>
chip_gen: v7x
topology: tpu7x:2x2x1
jax: 0.10.0
libtpu: 0.0.40
codegen_flags: <defaults>
</compile_context>

<pallas_src>
import jax
import jax.numpy as jnp
import numpy as np
from jax import lax
from jax.experimental import pallas as pl
from jax.experimental.pallas import tpu as pltpu


def _round_up(a, b):
    return ((a + b - 1) // b) * b


def _make_vq_kernel(hw_valid, tile_hw):
    """Kernel body, closing over the static valid spatial size and tile size."""

    def kernel(x_ref, e_ref, et_ref, q_ref, sse_ref):
        t = pl.program_id(1)                      # hw-tile index

        x = x_ref[0].astype(jnp.float32)          # (C=D, THW)  channels on sublanes
        e = e_ref[...].astype(jnp.float32)        # (K, D)
        e_t = et_ref[...].astype(jnp.float32)     # (D, K)
        K = e.shape[0]

        # ||e_k||^2 from the resident codebook (tiny) and the -2 scale folded
        # into the matmul operand.
        e2 = jnp.sum(e * e, axis=1, keepdims=True)     # (K, 1)
        e_s = -2.0 * e                                  # (K, D)

        # score[k, n] = ||e_k||^2 - 2 e_k . x_n   (||x_n||^2 dropped: per-column
        # constant, argmin unchanged).  MXU matmul, lane-dense (K, THW) result.
        score = jnp.dot(e_s, x, preferred_element_type=jnp.float32) + e2  # (K, THW)

        # first-occurrence argmin along k (same tie-break as torch.argmin)
        kiota = lax.broadcasted_iota(jnp.int32, score.shape, 0)   # (K, THW)
        min_s = jnp.min(score, axis=0, keepdims=True)             # (1, THW)
        idx = jnp.min(jnp.where(score == min_s, kiota, K),
                      axis=0, keepdims=True)                      # (1, THW)

        # codebook gather as (D,K)@(K,THW) one-hot matmul -> lane-dense (D, THW)
        onehot = (kiota == idx).astype(jnp.float32)               # (K, THW)
        q = jnp.dot(e_t, onehot, preferred_element_type=jnp.float32)  # (D, THW)
        q_ref[0] = q.astype(q_ref.dtype)

        # masked per-program partial SSE (padded hw columns excluded)
        col = lax.broadcasted_iota(jnp.int32, (1, x.shape[1]), 1)     # (1, THW)
        valid = (t * tile_hw + col) < hw_valid
        diff = jnp.where(valid, q - x, 0.0)                           # (D, THW)
        part = jnp.sum(diff * diff)
        sse_ref[...] = part + jnp.zeros(sse_ref.shape, sse_ref.dtype)

    return kernel


def vector_quantizer_forward(x, embeddings, commitment_cost=0.25, *, tile_hw=2048):
    """x: (B, C, H, W) float32, embeddings: (K, D) float32 with D == C."""
    B, C, H, W = x.shape
    K, D = embeddings.shape
    assert C == D, "channel dim must equal embedding_dim"
    HW = H * W

    emb = embeddings.astype(jnp.float32)           # (K, D)
    emb_t = jnp.transpose(emb)                     # (D, K), tiny one-time op

    # NCHW viewed as (B, C, HW) -- free reshape for contiguous data.
    x3 = x.reshape(B, C, HW).astype(jnp.float32)

    # Tile selection: lane-dense (multiple of 128), large by default.  Keep at
    # least two grid programs when possible so v7x's two TensorCores both work.
    hw128 = _round_up(HW, 128)
    tile = min(_round_up(max(tile_hw, 128), 128), hw128)
    if B == 1 and tile >= hw128 and hw128 >= 256:
        tile = _round_up(hw128 // 2, 128)
    hw_pad = _round_up(HW, tile)
    if hw_pad != HW:
        x3 = jnp.pad(x3, ((0, 0), (0, 0), (0, hw_pad - HW)))
    num_hw_tiles = hw_pad // tile

    kernel = _make_vq_kernel(HW, tile)

    q3, sse_blocks = pl.pallas_call(
        kernel,
        out_shape=(
            jax.ShapeDtypeStruct((B, C, hw_pad), jnp.float32),
            jax.ShapeDtypeStruct((B, num_hw_tiles, 8, 128), jnp.float32),
        ),
        grid_spec=pltpu.PrefetchScalarGridSpec(
            num_scalar_prefetch=0,
            grid=(B, num_hw_tiles),
            in_specs=[
                pl.BlockSpec((1, C, tile), lambda b, t: (b, 0, t)),   # x tile
                pl.BlockSpec((K, D), lambda b, t: (0, 0)),            # codebook
                pl.BlockSpec((D, K), lambda b, t: (0, 0)),            # codebook^T
            ],
            out_specs=[
                pl.BlockSpec((1, C, tile), lambda b, t: (b, 0, t)),   # quantized
                pl.BlockSpec((1, 1, 8, 128), lambda b, t: (b, t, 0, 0)),  # SSE part
            ],
        ),
        compiler_params=pltpu.CompilerParams(
            dimension_semantics=("parallel", "parallel"),
            vmem_limit_bytes=48 * 1024 * 1024,
        ),
    )(x3, emb, emb_t)

    if hw_pad != HW:
        q3 = q3[:, :, :HW]
    quantized = q3.reshape(B, C, H, W)

    # e_latent_loss and q_latent_loss are both mse(quantized, x) in the forward
    sse = jnp.sum(sse_blocks[:, :, 0, 0])
    mse = sse / jnp.float32(B * C * H * W)
    loss = (1.0 + commitment_cost) * mse

    # Forward value of the straight-through estimator x + sg(q - x) is q itself;
    # return q directly (avoids two extra HBM passes over the tensor).
    # TODO(synk): no custom VJP is defined; only the forward pass is covered.
    return quantized, loss


def _reference_forward(x, embeddings, commitment_cost=0.25):
    B, C, H, W = x.shape
    D = embeddings.shape[1]
    flat_x = jnp.transpose(x, (0, 2, 3, 1)).reshape(-1, D)
    dist = (jnp.sum(flat_x ** 2, axis=1, keepdims=True)
            - 2.0 * flat_x @ embeddings.T
            + jnp.sum(embeddings ** 2, axis=1))
    idx = jnp.argmin(dist, axis=1)
    q = embeddings[idx].reshape(B, H, W, C).transpose(0, 3, 1, 2)
    mse = jnp.mean((q - x) ** 2)
    loss = (1.0 + commitment_cost) * mse
    return q, loss


if __name__ == "__main__":
    # VQ config as instantiated inside ConvAutoencoderWithGRUMemory:
    #   VectorQuantizer(num_embeddings=128, embedding_dim=4)
    num_embeddings = 128
    embedding_dim = 4
    commitment_cost = 0.25

    key = jax.random.PRNGKey(0)
    kx, ke, kx2 = jax.random.split(key, 3)

    # bottleneck-shaped input to the VQ: (B=2, C=4, H=16, W=16)
    x = jax.random.normal(kx, (2, embedding_dim, 16, 16), dtype=jnp.float32)

    # deterministic init matching nn.init.uniform_(-1/K, 1/K)
    embeddings = jax.random.uniform(
        ke, (num_embeddings, embedding_dim),
        minval=-1.0 / num_embeddings, maxval=1.0 / num_embeddings,
        dtype=jnp.float32)

    # --- run 1: default tile (HW=256 fits in one lane-dense tile per batch) --
    quantized, loss = vector_quantizer_forward(x, embeddings, commitment_cost)
    quantized = jax.block_until_ready(quantized)
    loss = jax.block_until_ready(loss)

    q_ref, loss_ref = _reference_forward(x, embeddings, commitment_cost)
    np.testing.assert_allclose(np.asarray(quantized), np.asarray(q_ref),
                               rtol=1e-5, atol=1e-5)
    np.testing.assert_allclose(np.asarray(loss), np.asarray(loss_ref),
                               rtol=1e-5, atol=1e-5)

    # --- run 2: small tile exercises the multi-hw-tile path (grid (2, 2)) ----
    q1b, l1b = vector_quantizer_forward(x, embeddings, commitment_cost,
                                        tile_hw=128)
    q1b = jax.block_until_ready(q1b)
    l1b = jax.block_until_ready(l1b)
    np.testing.assert_allclose(np.asarray(q1b), np.asarray(q_ref),
                               rtol=1e-5, atol=1e-5)
    np.testing.assert_allclose(np.asarray(l1b), np.asarray(loss_ref),
                               rtol=1e-5, atol=1e-5)

    # --- run 3: HW not a multiple of 128 exercises the pad + mask path -------
    x2 = jax.random.normal(kx2, (2, embedding_dim, 10, 10), dtype=jnp.float32)
    q2, l2 = vector_quantizer_forward(x2, embeddings, commitment_cost)
    q2 = jax.block_until_ready(q2)
    l2 = jax.block_until_ready(l2)

    q2_ref, l2_ref = _reference_forward(x2, embeddings, commitment_cost)
    np.testing.assert_allclose(np.asarray(q2), np.asarray(q2_ref),
                               rtol=1e-5, atol=1e-5)
    np.testing.assert_allclose(np.asarray(l2), np.asarray(l2_ref),
                               rtol=1e-5, atol=1e-5)

    print("KERNEL_OK")
</pallas_src>

<mosaic_0001>
module attributes {stable_mosaic.version = 11 : i64} {
  func.func @kernel(%arg0: i32, %arg1: i32, %arg2: memref<1x4x256xf32, #tpu.memory_space<vmem>>, %arg3: memref<128x4xf32, #tpu.memory_space<vmem>>, %arg4: memref<4x128xf32, #tpu.memory_space<vmem>>, %arg5: memref<1x4x256xf32, #tpu.memory_space<vmem>>, %arg6: memref<1x1x8x128xf32, #tpu.memory_space<vmem>>) attributes {dimension_semantics = [#tpu.dimension_semantics<parallel>, #tpu.dimension_semantics<parallel>], iteration_bounds = array<i64: 2, 1>, scalar_prefetch = 0 : i64, scratch_operands = 0 : i64, tpu.core_type = #tpu.core_type<tc>, window_params = [{transform_indices = @transform_0, window_bounds = array<i64: 1, 4, 256>}, {pipeline_mode = #tpu.pipeline_mode<synchronous>, transform_indices = @transform_1, window_bounds = array<i64: 128, 4>}, {pipeline_mode = #tpu.pipeline_mode<synchronous>, transform_indices = @transform_2, window_bounds = array<i64: 4, 128>}, {transform_indices = @transform_3, window_bounds = array<i64: 1, 4, 256>}, {transform_indices = @transform_4, window_bounds = array<i64: 1, 1, 8, 128>}]} {
    %c0 = arith.constant 0 : index
    %c0_0 = arith.constant 0 : index
    %c0_1 = arith.constant 0 : index
    %0 = vector.load %arg2[%c0, %c0_0, %c0_1] : memref<1x4x256xf32, #tpu.memory_space<vmem>>, vector<1x4x256xf32>
    %1 = vector.shape_cast %0 : vector<1x4x256xf32> to vector<4x256xf32>
    %c0_2 = arith.constant 0 : index
    %c0_3 = arith.constant 0 : index
    %2 = vector.load %arg3[%c0_2, %c0_3] : memref<128x4xf32, #tpu.memory_space<vmem>>, vector<128x4xf32>
    %c0_4 = arith.constant 0 : index
    %c0_5 = arith.constant 0 : index
    %3 = vector.load %arg4[%c0_4, %c0_5] : memref<4x128xf32, #tpu.memory_space<vmem>>, vector<4x128xf32>
    %4 = arith.mulf %2, %2 : vector<128x4xf32>
    %cst = arith.constant dense<0.000000e+00> : vector<128xf32>
    %5 = vector.multi_reduction <add>, %4, %cst [1] : vector<128x4xf32> to vector<128xf32>
    %6 = vector.shape_cast %5 : vector<128xf32> to vector<128x1xf32>
    %cst_6 = arith.constant -2.000000e+00 : f32
    %7 = vector.broadcast %cst_6 : f32 to vector<128x4xf32>
    %8 = arith.mulf %7, %2 : vector<128x4xf32>
    %cst_7 = arith.constant dense<0.000000e+00> : vector<128x256xf32>
    %9 = tpu.matmul %8, %1, %cst_7 {dimension_numbers = #tpu.dot_dimension_numbers<[1], [0], [0], [1], [0, 0, 1, 1], [], []>} : vector<128x4xf32>, vector<4x256xf32>, vector<128x256xf32> -> vector<128x256xf32>
    %10 = vector.broadcast %6 : vector<128x1xf32> to vector<128x256xf32>
    %11 = arith.addf %9, %10 : vector<128x256xf32>
    %12 = tpu.iota {dimensions = array<i32: 0>} : vector<128x256xi32>
    %cst_8 = arith.constant dense<0x7F800000> : vector<256xf32>
    %13 = vector.multi_reduction <minimumf>, %11, %cst_8 [0] : vector<128x256xf32> to vector<256xf32>
    %14 = vector.shape_cast %13 : vector<256xf32> to vector<1x256xf32>
    %15 = vector.broadcast %14 : vector<1x256xf32> to vector<128x256xf32>
    %16 = arith.cmpf oeq, %11, %15 : vector<128x256xf32>
    %c128_i32 = arith.constant 128 : i32
    %17 = vector.broadcast %c128_i32 : i32 to vector<128x256xi32>
    %18 = arith.select %16, %12, %17 : vector<128x256xi1>, vector<128x256xi32>
    %cst_9 = arith.constant dense<2147483647> : vector<256xi32>
    %19 = vector.multi_reduction <minsi>, %18, %cst_9 [0] : vector<128x256xi32> to vector<256xi32>
    %20 = vector.shape_cast %19 : vector<256xi32> to vector<1x256xi32>
    %21 = vector.broadcast %20 : vector<1x256xi32> to vector<128x256xi32>
    %22 = arith.cmpi eq, %12, %21 : vector<128x256xi32>
    %23 = arith.extui %22 : vector<128x256xi1> to vector<128x256xi32>
    %24 = arith.sitofp %23 : vector<128x256xi32> to vector<128x256xf32>
    %cst_10 = arith.constant dense<0.000000e+00> : vector<4x256xf32>
    %25 = tpu.matmul %3, %24, %cst_10 {dimension_numbers = #tpu.dot_dimension_numbers<[1], [0], [0], [1], [0, 0, 1, 1], [], []>} : vector<4x128xf32>, vector<128x256xf32>, vector<4x256xf32> -> vector<4x256xf32>
    %c0_11 = arith.constant 0 : index
    %c0_12 = arith.constant 0 : index
    %c0_13 = arith.constant 0 : index
    %26 = vector.load %arg5[%c0_11, %c0_12, %c0_13] : memref<1x4x256xf32, #tpu.memory_space<vmem>>, vector<1x4x256xf32>
    %27 = vector.shape_cast %26 : vector<1x4x256xf32> to vector<4x256xf32>
    %28 = vector.shape_cast %25 : vector<4x256xf32> to vector<1x4x256xf32>
    tpu.vector_store %arg5[%c0_11, %c0_12, %c0_13], %28 {strides = array<i32>} : memref<1x4x256xf32, #tpu.memory_space<vmem>>, vector<1x4x256xf32>,
    %29 = tpu.iota {dimensions = array<i32: 1>} : vector<1x256xi32>
    %c256_i32 = arith.constant 256 : i32
    %30 = arith.muli %arg1, %c256_i32 : i32
    %31 = vector.broadcast %30 : i32 to vector<1x256xi32>
    %32 = arith.addi %31, %29 : vector<1x256xi32>
    %c256_i32_14 = arith.constant 256 : i32
    %33 = vector.broadcast %c256_i32_14 : i32 to vector<1x256xi32>
    %34 = arith.cmpi slt, %32, %33 : vector<1x256xi32>
    %35 = arith.subf %25, %1 : vector<4x256xf32>
    %cst_15 = arith.constant 0.000000e+00 : f32
    %36 = vector.shape_cast %34 : vector<1x256xi1> to vector<1x256xi1>
    %37 = vector.broadcast %36 : vector<1x256xi1> to vector<4x256xi1>
    %38 = vector.broadcast %cst_15 : f32 to vector<4x256xf32>
    %39 = arith.select %37, %35, %38 : vector<4x256xi1>, vector<4x256xf32>
    %40 = arith.mulf %39, %39 : vector<4x256xf32>
    %41 = vector.shape_cast %40 : vector<4x256xf32> to vector<1x4x256xf32>
    %cst_16 = arith.constant dense<0.000000e+00> : vector<1xf32>
    %42 = vector.multi_reduction <add>, %41, %cst_16 [1, 2] : vector<1x4x256xf32> to vector<1xf32>
    %43 = vector.shape_cast %42 : vector<1xf32> to vector<1x1x1xf32>
    %44 = vector.extract %43[0, 0, 0] : f32 from vector<1x1x1xf32>
    %cst_17 = arith.constant 0.000000e+00 : f32
    %45 = vector.broadcast %cst_17 : f32 to vector<1x1x8x128xf32>
    %46 = vector.broadcast %44 : f32 to vector<1x1x8x128xf32>
    %47 = arith.addf %46, %45 : vector<1x1x8x128xf32>
    %c0_18 = arith.constant 0 : index
    %c0_19 = arith.constant 0 : index
    %c0_20 = arith.constant 0 : index
    %c0_21 = arith.constant 0 : index
    %48 = vector.load %arg6[%c0_18, %c0_19, %c0_20, %c0_21] : memref<1x1x8x128xf32, #tpu.memory_space<vmem>>, vector<1x1x8x128xf32>
    tpu.vector_store %arg6[%c0_18, %c0_19, %c0_20, %c0_21], %47 {strides = array<i32>} : memref<1x1x8x128xf32, #tpu.memory_space<vmem>>, vector<1x1x8x128xf32>,
    return
  }
  func.func @transform_0(%arg0: i32, %arg1: i32) -> (i32, i32, i32) {
    %c0_i32 = arith.constant 0 : i32
    %c0_i32_0 = arith.constant 0 : i32
    return %arg0, %c0_i32, %arg1 : i32, i32, i32
  }
  func.func @transform_1(%arg0: i32, %arg1: i32) -> (i32, i32) {
    %c0_i32 = arith.constant 0 : i32
    %c0_i32_0 = arith.constant 0 : i32
    %c0_i32_1 = arith.constant 0 : i32
    return %c0_i32, %c0_i32_0 : i32, i32
  }
  func.func @transform_2(%arg0: i32, %arg1: i32) -> (i32, i32) {
    %c0_i32 = arith.constant 0 : i32
    %c0_i32_0 = arith.constant 0 : i32
    %c0_i32_1 = arith.constant 0 : i32
    return %c0_i32, %c0_i32_0 : i32, i32
  }
  func.func @transform_3(%arg0: i32, %arg1: i32) -> (i32, i32, i32) {
    %c0_i32 = arith.constant 0 : i32
    %c0_i32_0 = arith.constant 0 : i32
    return %arg0, %c0_i32, %arg1 : i32, i32, i32
  }
  func.func @transform_4(%arg0: i32, %arg1: i32) -> (i32, i32, i32, i32) {
    %c0_i32 = arith.constant 0 : i32
    %c0_i32_0 = arith.constant 0 : i32
    %c0_i32_1 = arith.constant 0 : i32
    return %arg0, %arg1, %c0_i32, %c0_i32_0 : i32, i32, i32, i32
  }
}

</mosaic_0001>

<bundles_post_ra>
// kernel: tpu_custom_call.1
= control target key start
LH: loop header
LB: loop body
LE: loop exit
PB: predicated region body
PF: predicated region fallthrough
CT: control target
= control target key end

     0   :  { %10 = vsyncpa [#allocation3], 0  ;;  %s2096_s0 = inlined_call_operand.vmem [shape: f32[2,4,256], index: 0, kind: input, shape index: {}]   ;;  %s2097_s1 = inlined_call_operand.vmem [shape: f32[128,4], index: 1, kind: input, shape index: {}]   ;;  %s2098_s2 = inlined_call_operand.vmem [shape: f32[4,128], index: 2, kind: input, shape index: {}]   ;;  %s2099_s3 = inlined_call_operand.hbm [shape: f32[2,4,256], index: 3, kind: output, shape index: {0}]   ;;  %s2100_s4 = inlined_call_operand.hbm [shape: f32[2,1,8,128], index: 4, kind: output, shape index: {1}]  }
   0x1   :  { %12 = vsyncpa [#allocation3 + $0x1], 0 }
   0x2   :  { %13 = vsyncpa [#allocation5], 0 }
   0x3   :  { %15 = vsyncpa [#allocation5 + $0x1], 0  ;;  %s1446_s15 = smov 0   ;;  %s1448_s16 = smov 0  }
   0x4   :  { %s1450_s17 = smov 0   ;;  %s1452_s18 = smov 0  }
   0x5   :  { %s1454_s19 = smov 0   ;;  %s1456_s20 = smov 0  }
   0x6 LB: > { %s1108_s21 = sadd.s32 4294967295, %s1415_s20   ;;  %s1109_s22 = sadd.s32 4294967294, %s1415_s20   ;;  %s1415_s20 = sphi %s1456_s20, %s21_s20   ;;  %s1411_s19 = sphi %s1454_s19, %s2118_s19   ;;  %s1407_s18 = sphi %s1452_s18, %s2117_s18   ;;  %s1403_s17 = sphi %s1450_s17, %s2116_s17   ;;  %s1399_s16 = sphi %s1448_s16, %s2115_s16   ;;  %s1395_s15 = sphi %s1446_s15, %s2114_s15  }
   0x7   : > { %s33_s23 = sadd.s32 1, %s1411_s19  ;;  %s112_s24 = sadd.s32 1, %s1403_s17 }
   0x8   : > { %p35_p0 = scmp.ge.s32.totalorder %s33_s23, 2  ;;  %p122_p1 = scmp.ne.s32.totalorder %s1403_s17, %s1399_s16 }
   0x9   : > { %p123_p2 = scmp.eq.s32.totalorder %s1108_s21, 1  ;;  %p128_p3 = scmp.ne.s32.totalorder %s1399_s16, %s1395_s15 }
   0xa   : > { %s2120_s23 = smov (%p35_p0, %s33_s23), 0  ;;  %p129_p5 = scmp.eq.s32.totalorder %s1109_s22, 1 }
   0xb   : > { %p1486_p4 = por %p123_p2, %p122_p1  ;;  %s107_s26 = ssub.s32 %s1411_s19, %s2120_s23 }
   0xc   : > { %p1112_p6 = scmp.ge.s32.totalorder %s1415_s20, 1  ;;  %p110_p7 = scmp.eq.s32.totalorder %s107_s26, 0 }
   0xd   : > { %p1493_p8 = por %p129_p5, %p128_p3  ;;  %p194_p9 = scmp.lt.s32.totalorder %s1415_s20, 3 }
   0xe   : > { %s1499_s28 = scalar_select %p110_p7, %s1403_s17, %s112_s24  }
   0xf   : > { %p195_p10 = pnand %p1112_p6, %p194_p9 }
  0x10   : > { %p230_p11 = scmp.lt.s32.totalorder (!%p195_p10), %s1407_s18, 1  ;;  %v241_v0 = vld [vmem:[%s2097_s1] sm:$0xff] (!%p195_p10)  ;;  %v242_v1 = vld [vmem:[%s2097_s1 + $0x8] sm:$0xff] (!%p195_p10)  ;;  %v1417_v2 = vmov (!%p195_p10), 0.0   ;;  %v243_v3 = vld [vmem:[%s2097_s1 + $0x10] sm:$0xff] (!%p195_p10)  ;;  %vm274_vm0 = vcmask (!%p195_p10), 31744  }
  0x11   : > { %198 = sbr.rel (%p195_p10) target bundleno = 844 (0x34c), region = 32  ;;  %458 = vmatprep.mubr.f32.mxu0 (!%p195_p10), %v1417_v2  ;;  %v258_v4 = vmul.f32 (!%p195_p10), %v241_v0, %v241_v0  ;;  %v259_v5 = vmul.f32 (!%p195_p10), %v242_v1, %v242_v1  ;;  %916 = vmatprep.mubr.f32.mxu1 (!%p195_p10), %v1417_v2  ;;  %v260_v6 = vmul.f32 (!%p195_p10), %v243_v3, %v243_v3  ;;  %v244_v7 = vld [vmem:[%s2097_s1 + $0x18] sm:$0xff] (!%p195_p10)  ;;  %v245_v9 = vld [vmem:[%s2097_s1 + $0x20] sm:$0xff] (!%p195_p10)  ;;  %vm2101_vm1 = vcmask (!%p195_p10), 1043456   ;;  %v246_v17 = vld [vmem:[%s2097_s1 + $0x28] sm:$0xff] (!%p195_p10)  ;;  %s2006_s10 = sand.u32 (!%p195_p10), 1, %s1399_s16  }
  0x12   : > { %v261_v10 = vmul.f32 (!%p195_p10), %v244_v7, %v244_v7  ;;  %v262_v12 = vmul.f32 (!%p195_p10), %v245_v9, %v245_v9  ;;  %v323_v16 = vmul.f32 (!%p195_p10), -2.0, %v241_v0  ;;  %v247_v18 = vld [vmem:[%s2097_s1 + $0x30] sm:$0xff] (!%p195_p10)  ;;  %v263_v20 = vmul.f32 (!%p195_p10), %v246_v17, %v246_v17  ;;  %v248_v24 = vld [vmem:[%s2097_s1 + $0x38] sm:$0xff] (!%p195_p10)  ;;  %v249_v25 = vld [vmem:[%s2097_s1 + $0x40] sm:$0xff] (!%p195_p10)  ;;  %s1113_s11 = sshll.u32 (!%p195_p10), %s2006_s10, 3  ;;  %s1207_s13 = sshll.u32 (!%p195_p10), %s1407_s18, 7 }
  0x13   : > { %v275_v8 = vsel (!%p195_p10), %vm274_vm0, %v258_v4, 0.0  ;;  %v278_v11 = vsel (!%p195_p10), %vm274_vm0, %v259_v5, 0.0  ;;  %v281_v14 = vsel (!%p195_p10), %vm274_vm0, %v260_v6, 0.0  ;;  %v264_v22 = vmul.f32 (!%p195_p10), %v247_v18, %v247_v18  ;;  %v250_v31 = vld [vmem:[%s2097_s1 + $0x48] sm:$0xff] (!%p195_p10)  ;;  %v251_v32 = vld [vmem:[%s2097_s1 + $0x50] sm:$0xff] (!%p195_p10)  ;;  %v252_v38 = vld [vmem:[%s2097_s1 + $0x58] sm:$0xff] (!%p195_p10)  ;;  %s2021_s22 = scalar_lea.hbm (!%p195_p10), %s2099_s3, %s1207_s13 }
  0x14   : > { %276 = vadd.xlane.f32.xlu0 (!%p195_p10), %v275_v8  ;;  %282 = vadd.xlane.f32.xlu1 (!%p195_p10), %v281_v14  ;;  %v284_v19 = vsel (!%p195_p10), %vm274_vm0, %v261_v10, 0.0  ;;  %v287_v21 = vsel (!%p195_p10), %vm274_vm0, %v262_v12, 0.0  ;;  %v324_v23 = vmul.f32 (!%p195_p10), -2.0, %v242_v1  ;;  %v290_v26 = vsel (!%p195_p10), %vm274_vm0, %v263_v20, 0.0  ;;  %v253_v39 = vld [vmem:[%s2097_s1 + $0x60] sm:$0xff] (!%p195_p10)  ;;  %v254_v45 = vld [vmem:[%s2097_s1 + $0x68] sm:$0xff] (!%p195_p10) }
  0x15   : > { %v265_v27 = vmul.f32 (!%p195_p10), %v248_v24, %v248_v24  ;;  %v293_v28 = vsel (!%p195_p10), %vm274_vm0, %v264_v22, 0.0  ;;  %v266_v29 = vmul.f32 (!%p195_p10), %v249_v25, %v249_v25  ;;  %v325_v30 = vmul.f32 (!%p195_p10), -2.0, %v243_v3  ;;  %v255_v46 = vld [vmem:[%s2097_s1 + $0x70] sm:$0xff] (!%p195_p10)  ;;  %v256_v52 = vld [vmem:[%s2097_s1 + $0x78] sm:$0xff] (!%p195_p10)  ;;  %s964_s26 = scalar_lea.sflag (!%p195_p10), [#allocation3], %s2006_s10  ;;  %s1419_s30 = smov (!%p195_p10), [#allocation2]  }
  0x16   : > { %v267_v34 = vmul.f32 (!%p195_p10), %v250_v31, %v250_v31  ;;  %v268_v36 = vmul.f32 (!%p195_p10), %v251_v32, %v251_v32  ;;  %v326_v37 = vmul.f32 (!%p195_p10), -2.0, %v244_v7  ;;  %v269_v41 = vmul.f32 (!%p195_p10), %v252_v38, %v252_v38  ;;  %s1309_s5 = sshll.u32 (!%p195_p10), %s1419_s30, 4  ;;  %s1310_s5 = int_to_ptr.vmem [resolvable:$false] %s1309_s5 }
  0x17   : > { %v296_v33 = vsel (!%p195_p10), %vm274_vm0, %v265_v27, 0.0  ;;  %v299_v35 = vsel (!%p195_p10), %vm274_vm0, %v266_v29, 0.0  ;;  %v270_v43 = vmul.f32 (!%p195_p10), %v253_v39, %v253_v39  ;;  %v327_v44 = vmul.f32 (!%p195_p10), -2.0, %v245_v9  ;;  %s1311_s6 = scalar_lea.vmem (!%p195_p10), %s1310_s5, 256 }
  0x18   : > { %s231_s9 = scalar_select %p230_p11, %s1407_s18, 1  ;;  %279 = vadd.xlane.f32.xlu0 %v278_v11  ;;  %285 = vadd.xlane.f32.xlu1 %v284_v19  ;;  %v302_v40 = vsel %vm274_vm0, %v267_v34, 0.0  ;;  %v305_v42 = vsel %vm274_vm0, %v268_v36, 0.0  ;;  %v308_v47 = vsel %vm274_vm0, %v269_v41, 0.0  ;;  %v271_v48 = vmul.f32 %v254_v45, %v254_v45 }
  0x19   : > { %v311_v49 = vsel %vm274_vm0, %v270_v43, 0.0  ;;  %v272_v50 = vmul.f32 %v255_v46, %v255_v46  ;;  %v328_v51 = vmul.f32 -2.0, %v246_v17  ;;  %v273_v54 = vmul.f32 %v256_v52, %v256_v52 }
  0x1a   : > { %s1206_s12 = sshll.u32 %s231_s9, 3  ;;  %v314_v53 = vsel %vm274_vm0, %v271_v48, 0.0  ;;  %v329_v56 = vmul.f32 -2.0, %v247_v18  ;;  %v330_v58 = vmul.f32 -2.0, %v248_v24  ;;  %v331_v59 = vmul.f32 -2.0, %v249_v25 }
  0x1b   : > { %s237_s24 = scalar_lea.vmem %s2096_s0, %s1206_s12  ;;  %v317_v55 = vsel %vm274_vm0, %v272_v50, 0.0  ;;  %v320_v57 = vsel %vm274_vm0, %v273_v54, 0.0  ;;  %v332_v60 = vmul.f32 -2.0, %v250_v31  ;;  %v333_v61 = vmul.f32 -2.0, %v251_v32  ;;  %s221_s12 = scalar_lea.vmem [#allocation2], %s1113_s11 }
  0x1c   : > { %v1525_v13 = vld [vmem:[%s237_s24] sm:$0xff]  ;;  %288 = vadd.xlane.f32.xlu0 %v287_v21  ;;  %291 = vadd.xlane.f32.xlu1 %v290_v26  ;;  %v334_v62 = vmul.f32 -2.0, %v252_v38  ;;  %v335_v63 = vmul.f32 -2.0, %v253_v39  ;;  %v336_v0 = vmul.f32 -2.0, %v254_v45  ;;  %v337_v1 = vmul.f32 -2.0, %v255_v46  ;;  %s985_s24 = sshll.u32 %s221_s12, 4  ;;  %s986_s24 = int_to_ptr.vmem [resolvable:$true] %s985_s24 }
  0x1d   : > { %v1530_v15 = vcombine.high %v1525_v13, %v1525_v13  ;;  %v338_v3 = vmul.f32 -2.0, %v256_v52  ;;  %s1305_s29 = scalar_lea.vmem %s986_s24, 128  ;;  %p1312_p1 = scmp.lt.s32.totalorder %s986_s24, %s1310_s5 }
  0x1e   : > { %p1306_p12 = scmp.ne.s32.totalorder %s986_s24, %s1305_s29  ;;  %p1313_p2 = scmp.lt.s32.totalorder %s1311_s6, %s1305_s29 }
  0x1f   : > { %1117 = vmatprep.subr.msk.mxu0 %vm2101_vm1, %v1530_v15 }
  0x20   : > { %1118 = vmatpush1.msk.msra.mxu0 %vm2101_vm1, %v1525_v13  ;;  %294 = vadd.xlane.f32.xlu0 %v293_v28  ;;  %p1307_p13 = pnand %p1306_p12, %p1486_p4  ;;  %p1314_p3 = por %p1313_p2, %p1312_p1 }
  0x21   : > { %1119 = vmatmul.mubr.msk.f32.vlgmr.msra.gmra.mrb[0].mxu0 %vm274_vm0, %v323_v16  ;;  %297 = vadd.xlane.f32.xlu1 %v296_v33 }
  0x22   : > { %464 = vmatprep.mubr.f32.mxu0 %v1417_v2  ;;  %p1308_p0 = pneg %p1307_p13 }
  0x24   : > { %300 = vadd.xlane.f32.xlu0 %v299_v35  ;;  %p1315_p5 = pnand %p1314_p3, %p1308_p0 }
  0x25   : > { %1120 = vmatmul.mubr.msk.f32.gmra.mrb[2].mxu0 %vm274_vm0, %v324_v23  ;;  %303 = vadd.xlane.f32.xlu1 %v302_v40 }
  0x26   : > { %470 = vmatprep.mubr.f32.mxu0 %v1417_v2 }
  0x28   : > { %306 = vadd.xlane.f32.xlu0 %v305_v42 }
  0x29   : > { %1121 = vmatmul.mubr.msk.f32.gmra.mrb[4].mxu0 %vm274_vm0, %v325_v30  ;;  %309 = vadd.xlane.f32.xlu1 %v308_v47 }
  0x2a   : > { %476 = vmatprep.mubr.f32.mxu0 %v1417_v2 }
  0x2c   : > { %312 = vadd.xlane.f32.xlu0 %v311_v49 }
  0x2d   : > { %1122 = vmatmul.mubr.msk.f32.gmra.mrb[6].mxu0 %vm274_vm0, %v326_v37  ;;  %315 = vadd.xlane.f32.xlu1 %v314_v53 }
  0x2e   : > { %482 = vmatprep.mubr.f32.mxu0 %v1417_v2 }
  0x30   : > { %318 = vadd.xlane.f32.xlu0 %v317_v55 }
  0x31   : > { %1123 = vmatmul.mubr.msk.f32.gmra.mrb[8].mxu0 %vm274_vm0, %v327_v44  ;;  %321 = vadd.xlane.f32.xlu1 %v320_v57 }
  0x32   : > { %488 = vmatprep.mubr.f32.mxu0 %v1417_v2 }
  0x35   : > { %1124 = vmatmul.mubr.msk.f32.gmra.mrb[10].mxu0 %vm274_vm0, %v328_v51 }
  0x36   : > { %494 = vmatprep.mubr.f32.mxu0 %v1417_v2 }
  0x39   : > { %1125 = vmatmul.mubr.msk.f32.gmra.mrb[12].mxu0 %vm274_vm0, %v329_v56 }
  0x3a   : > { %500 = vmatprep.mubr.f32.mxu0 %v1417_v2 }
  0x3d   : > { %1126 = vmatmul.mubr.msk.f32.gmra.mrb[14].mxu0 %vm274_vm0, %v330_v58 }
  0x3e   : > { %506 = vmatprep.mubr.f32.mxu0 %v1417_v2 }
  0x41   : > { %1127 = vmatmul.mubr.msk.f32.gmra.mrb[16].mxu0 %vm274_vm0, %v331_v59 }
  0x42   : > { %512 = vmatprep.mubr.f32.mxu0 %v1417_v2 }
  0x45   : > { %1128 = vmatmul.mubr.msk.f32.gmra.mrb[18].mxu0 %vm274_vm0, %v332_v60 }
  0x46   : > { %518 = vmatprep.mubr.f32.mxu0 %v1417_v2 }
  0x49   : > { %1129 = vmatmul.mubr.msk.f32.gmra.mrb[20].mxu0 %vm274_vm0, %v333_v61 }
  0x4a   : > { %524 = vmatprep.mubr.f32.mxu0 %v1417_v2 }
  0x4d   : > { %1130 = vmatmul.mubr.msk.f32.gmra.mrb[22].mxu0 %vm274_vm0, %v334_v62 }
  0x4e   : > { %530 = vmatprep.mubr.f32.mxu0 %v1417_v2 }
  0x51   : > { %1131 = vmatmul.mubr.msk.f32.gmra.mrb[24].mxu0 %vm274_vm0, %v335_v63 }
  0x52   : > { %536 = vmatprep.mubr.f32.mxu0 %v1417_v2 }
  0x55   : > { %1132 = vmatmul.mubr.msk.f32.gmra.mrb[26].mxu0 %vm274_vm0, %v336_v0 }
  0x56   : > { %542 = vmatprep.mubr.f32.mxu0 %v1417_v2 }
  0x59   : > { %1133 = vmatmul.mubr.msk.f32.gmra.mrb[28].mxu0 %vm274_vm0, %v337_v1 }
  0x5a   : > { %548 = vmatprep.mubr.f32.mxu0 %v1417_v2 }
  0x5d   : > { %1134 = vmatmul.mubr.msk.f32.gmra.mrb[30].mxu0 %vm274_vm0, %v338_v3 }
  0xa1   : > { %v277_v6 = vpop.xlane.xlu0 %276  ;;  %v283_v8 = vpop.xlane.xlu1 %282 }
  0xa5   : > { %v280_v17 = vpop.xlane.xlu0 %279  ;;  %v286_v2 = vpop.xlane.xlu1 %285 }
  0xa9   : > { %v289_v27 = vpop.xlane.xlu0 %288  ;;  %v292_v34 = vpop.xlane.xlu1 %291 }
  0xad   : > { %v295_v41 = vpop.xlane.xlu0 %294 }
  0xae   : > { %v298_v48 = vpop.xlane.xlu1 %297 }
  0xb1   : > { %v301_v55 = vpop.xlane.xlu0 %300 }
  0xb2   : > { %v304_v62 = vpop.xlane.xlu1 %303 }
  0xf4   : > { %v460_v4 = vpop.f32.mrb[0].mxu0 }
  0xf5   : > { %v462_v5 = vpop.f32.mrb[1].mxu0  ;;  %v1613_v11 = vadd.f32 %v460_v4, %v277_v6 }
  0xf6   : > { %v1617_v16 = vadd.f32 %v462_v5, %v277_v6  ;;  %v307_v6 = vpop.xlane.xlu0 %306 }
  0xf8   : > { %v466_v7 = vpop.f32.mrb[2].mxu0 }
  0xf9   : > { %v468_v9 = vpop.f32.mrb[3].mxu0  ;;  %v1625_v22 = vadd.f32 %v466_v7, %v280_v17 }
  0xfa   : > { %v1629_v25 = vadd.f32 %v468_v9, %v280_v17 }
  0xfc   : > { %v472_v10 = vpop.f32.mrb[4].mxu0 }
  0xfd   : > { %v1615_v12 = vadd.f32 %v472_v10, %v283_v8  ;;  %v474_v14 = vpop.f32.mrb[5].mxu0 }
  0xfe   : > { %v1619_v18 = vadd.f32 %v474_v14, %v283_v8 }
  0xff   : > { %v572_v19 = vmin.f32 %v1613_v11, %v1615_v12 }
 0x100   : > { %v593_v20 = vmin.f32 %v1617_v16, %v1619_v18  ;;  %v478_v21 = vpop.f32.mrb[6].mxu0 }
 0x101   : > { %v1627_v23 = vadd.f32 %v478_v21, %v286_v2  ;;  %v480_v24 = vpop.f32.mrb[7].mxu0 }
 0x102   : > { %v1631_v26 = vadd.f32 %v480_v24, %v286_v2  ;;  %v310_v2 = vpop.xlane.xlu1 %309 }
 0x103   : > { %v573_v28 = vmin.f32 %v1625_v22, %v1627_v23 }
 0x104   : > { %v594_v29 = vmin.f32 %v1629_v25, %v1631_v26  ;;  %v484_v30 = vpop.f32.mrb[8].mxu0 }
 0x105   : > { %v1637_v31 = vadd.f32 %v484_v30, %v289_v27  ;;  %v486_v32 = vpop.f32.mrb[9].mxu0 }
 0x106   : > { %v1639_v33 = vadd.f32 %v486_v32, %v289_v27 }
 0x107   : > { %v574_v35 = vmin.f32 %v572_v19, %v1637_v31 }
 0x108   : > { %v595_v36 = vmin.f32 %v593_v20, %v1639_v33  ;;  %v490_v37 = vpop.f32.mrb[10].mxu0 }
 0x109   : > { %v1643_v38 = vadd.f32 %v490_v37, %v292_v34  ;;  %v492_v39 = vpop.f32.mrb[11].mxu0 }
 0x10a   : > { %v1645_v40 = vadd.f32 %v492_v39, %v292_v34  ;;  %v316_v39 = vpop.xlane.xlu1 %315 }
 0x10b   : > { %v575_v42 = vmin.f32 %v573_v28, %v1643_v38 }
 0x10c   : > { %v596_v43 = vmin.f32 %v594_v29, %v1645_v40  ;;  %v496_v44 = vpop.f32.mrb[12].mxu0  ;;  %v313_v29 = vpop.xlane.xlu0 %312 }
 0x10d   : > { %v1649_v45 = vadd.f32 %v496_v44, %v295_v41  ;;  %v498_v46 = vpop.f32.mrb[13].mxu0 }
 0x10e   : > { %v1651_v47 = vadd.f32 %v498_v46, %v295_v41 }
 0x10f   : > { %v576_v49 = vmin.f32 %v574_v35, %v1649_v45 }
 0x110   : > { %v597_v50 = vmin.f32 %v595_v36, %v1651_v47  ;;  %v502_v51 = vpop.f32.mrb[14].mxu0 }
 0x111   : > { %v1655_v52 = vadd.f32 %v502_v51, %v298_v48  ;;  %v504_v53 = vpop.f32.mrb[15].mxu0 }
 0x112   : > { %v1657_v54 = vadd.f32 %v504_v53, %v298_v48 }
 0x113   : > { %v577_v56 = vmin.f32 %v575_v42, %v1655_v52 }
 0x114   : > { %v598_v57 = vmin.f32 %v596_v43, %v1657_v54  ;;  %v508_v58 = vpop.f32.mrb[16].mxu0 }
 0x115   : > { %v1661_v59 = vadd.f32 %v508_v58, %v301_v55  ;;  %v510_v60 = vpop.f32.mrb[17].mxu0  ;;  %v322_v58 = vpop.xlane.xlu1 %321 }
 0x116   : > { %v1663_v61 = vadd.f32 %v510_v60, %v301_v55 }
 0x117   : > { %v578_v63 = vmin.f32 %v576_v49, %v1661_v59  ;;  %v319_v49 = vpop.xlane.xlu0 %318 }
 0x118   : > { %v599_v0 = vmin.f32 %v597_v50, %v1663_v61  ;;  %v514_v1 = vpop.f32.mrb[18].mxu0 }
 0x119   : > { %v1667_v3 = vadd.f32 %v514_v1, %v304_v62  ;;  %v516_v4 = vpop.f32.mrb[19].mxu0 }
 0x11a   : > { %v1669_v5 = vadd.f32 %v516_v4, %v304_v62 }
 0x11b   : > { %v579_v7 = vmin.f32 %v577_v56, %v1667_v3 }
 0x11c   : > { %v600_v8 = vmin.f32 %v598_v57, %v1669_v5  ;;  %v520_v9 = vpop.f32.mrb[20].mxu0 }
 0x11d   : > { %v1673_v10 = vadd.f32 %v520_v9, %v307_v6  ;;  %v522_v14 = vpop.f32.mrb[21].mxu0 }
 0x11e   : > { %v1675_v17 = vadd.f32 %v522_v14, %v307_v6  ;;  %v555_v14 = vlaneseq }
 0x11f   : > { %v580_v19 = vmin.f32 %v578_v63, %v1673_v10 }
 0x120   : > { %v601_v20 = vmin.f32 %v599_v0, %v1675_v17  ;;  %v526_v21 = vpop.f32.mrb[22].mxu0 }
 0x121   : > { %v1679_v24 = vadd.f32 %v526_v21, %v310_v2  ;;  %v528_v27 = vpop.f32.mrb[23].mxu0 }
 0x122   : > { %v1681_v28 = vadd.f32 %v528_v27, %v310_v2  ;;  %v1709_v27 = vshrl.u32 %v555_v14, 7 }
 0x123   : > { %v581_v30 = vmin.f32 %v579_v7, %v1679_v24 }
 0x124   : > { %v602_v32 = vmin.f32 %v600_v8, %v1681_v28  ;;  %v532_v34 = vpop.f32.mrb[24].mxu0 }
 0x125   : > { %v1685_v35 = vadd.f32 %v532_v34, %v313_v29  ;;  %v534_v36 = vpop.f32.mrb[25].mxu0 }
 0x126   : > { %v1687_v37 = vadd.f32 %v534_v36, %v313_v29  ;;  %v1712_v36 = vadd.s32 8, %v1709_v27 }
 0x127   : > { %v582_v41 = vmin.f32 %v580_v19, %v1685_v35 }
 0x128   : > { %v603_v42 = vmin.f32 %v601_v20, %v1687_v37  ;;  %v538_v43 = vpop.f32.mrb[26].mxu0 }
 0x129   : > { %v1691_v44 = vadd.f32 %v538_v43, %v316_v39  ;;  %v540_v46 = vpop.f32.mrb[27].mxu0  ;;  %v1721_v43 = vadd.s32 32, %v1709_v27 }
 0x12a   : > { %v1693_v48 = vadd.f32 %v540_v46, %v316_v39  ;;  %v1715_v39 = vadd.s32 16, %v1709_v27  ;;  %v1724_v46 = vadd.s32 40, %v1709_v27 }
 0x12b   : > { %v583_v50 = vmin.f32 %v581_v30, %v1691_v44 }
 0x12c   : > { %v604_v51 = vmin.f32 %v602_v32, %v1693_v48  ;;  %v544_v53 = vpop.f32.mrb[28].mxu0 }
 0x12d   : > { %v1697_v55 = vadd.f32 %v544_v53, %v319_v49  ;;  %v546_v56 = vpop.f32.mrb[29].mxu0  ;;  %v1736_v53 = vadd.s32 72, %v1709_v27 }
 0x12e   : > { %v1699_v57 = vadd.f32 %v546_v56, %v319_v49  ;;  %v1727_v49 = vadd.s32 48, %v1709_v27 }
 0x12f   : > { %v584_v60 = vmin.f32 %v582_v41, %v1697_v55 }
 0x130   : > { %v605_v62 = vmin.f32 %v603_v42, %v1699_v57  ;;  %v550_v63 = vpop.f32.mrb[30].mxu0  ;;  %v1718_v42 = vadd.s32 24, %v1709_v27 }
 0x131   : > { %v1703_v0 = vadd.f32 %v550_v63, %v322_v58  ;;  %v552_v1 = vpop.f32.mrb[31].mxu0 }
 0x132   : > { %v1705_v4 = vadd.f32 %v552_v1, %v322_v58  ;;  %v1741_v58 = vadd.s32 80, %v1709_v27  ;;  %v1782_v1 = vadd.s32 104, %v1709_v27 }
 0x133   : > { %v585_v6 = vmin.f32 %v583_v50, %v1703_v0  ;;  %v1730_v50 = vadd.s32 56, %v1709_v27 }
 0x134   : > { %v606_v7 = vmin.f32 %v604_v51, %v1705_v4  ;;  %v1733_v51 = vadd.s32 64, %v1709_v27 }
 0x135   : > { %v586_v8 = vmin.f32 %v584_v60, %v585_v6  ;;  %v1744_v60 = vadd.s32 88, %v1709_v27  ;;  %v1785_v6 = vadd.s32 112, %v1709_v27 }
 0x136   : > { %v607_v9 = vmin.f32 %v605_v62, %v606_v7  ;;  %v1747_v62 = vadd.s32 96, %v1709_v27  ;;  %v1788_v7 = vadd.s32 120, %v1709_v27 }
 0x137   : > { %v587_v2 = vrot.slane %v586_v8, 4 }
 0x138   : > { %v608_v19 = vrot.slane %v607_v9, 4 }
 0x139   : > { %v588_v20 = vmin.f32 %v586_v8, %v587_v2 }
 0x13a   : > { %v609_v21 = vmin.f32 %v607_v9, %v608_v19 }
 0x13b   : > { %v589_v29 = vrot.slane %v588_v20, 2 }
 0x13c   : > { %v610_v30 = vrot.slane %v609_v21, 2 }
 0x13d   : > { %v590_v32 = vmin.f32 %v588_v20, %v589_v29 }
 0x13e   : > { %v611_v34 = vmin.f32 %v609_v21, %v610_v30 }
 0x13f   : > { %v591_v41 = vrot.slane %v590_v32, 1 }
 0x140   : > { %v612_v63 = vrot.slane %v611_v34, 1 }
 0x141   : > { %v1738_v56 = vmin.f32 %v590_v32, %v591_v41 }
 0x142   : > { %v1790_v8 = vmin.f32 %v611_v34, %v612_v63 }
 0x143   : > { %vm614_vm2 = vcmp.eq.f32.partialorder %v1613_v11, %v1738_v56  ;;  %vm616_vm3 = vcmp.eq.f32.partialorder %v1625_v22, %v1738_v56  ;;  %vm618_vm4 = vcmp.eq.f32.partialorder %v1615_v12, %v1738_v56  ;;  %vm620_vm5 = vcmp.eq.f32.partialorder %v1627_v23, %v1738_v56 }
 0x144   : > { %vm622_vm6 = vcmp.eq.f32.partialorder %v1637_v31, %v1738_v56  ;;  %vm624_vm7 = vcmp.eq.f32.partialorder %v1643_v38, %v1738_v56  ;;  %vm626_vm8 = vcmp.eq.f32.partialorder %v1649_v45, %v1738_v56  ;;  %vm628_vm9 = vcmp.eq.f32.partialorder %v1655_v52, %v1738_v56 }
 0x145   : > { %vm630_vm10 = vcmp.eq.f32.partialorder %v1661_v59, %v1738_v56  ;;  %vm632_vm11 = vcmp.eq.f32.partialorder %v1667_v3, %v1738_v56  ;;  %vm634_vm12 = vcmp.eq.f32.partialorder %v1673_v10, %v1738_v56  ;;  %vm636_vm13 = vcmp.eq.f32.partialorder %v1679_v24, %v1738_v56 }
 0x146   : > { %vm638_vm14 = vcmp.eq.f32.partialorder %v1685_v35, %v1738_v56  ;;  %vm640_vm15 = vcmp.eq.f32.partialorder %v1691_v44, %v1738_v56  ;;  %vm642_vm0 = vcmp.eq.f32.partialorder %v1697_v55, %v1738_v56  ;;  %vm644_vm1 = vcmp.eq.f32.partialorder %v1703_v0, %v1738_v56 }
 0x147   : > { %v646_v9 = vsel %vm614_vm2, %v1709_v27, 128  ;;  %v648_v14 = vsel %vm616_vm3, %v1712_v36, 128  ;;  %v650_v2 = vsel %vm618_vm4, %v1715_v39, 128  ;;  %v652_v19 = vsel %vm620_vm5, %v1718_v42, 128 }
 0x148   : > { %v654_v11 = vsel %vm622_vm6, %v1721_v43, 128  ;;  %v656_v22 = vsel %vm624_vm7, %v1724_v46, 128  ;;  %v658_v12 = vsel %vm626_vm8, %v1727_v49, 128  ;;  %v660_v23 = vsel %vm628_vm9, %v1730_v50, 128 }
 0x149   : > { %v662_v31 = vsel %vm630_vm10, %v1733_v51, 128  ;;  %v664_v38 = vsel %vm632_vm11, %v1736_v53, 128  ;;  %v666_v45 = vsel %vm634_vm12, %v1741_v58, 128  ;;  %v668_v52 = vsel %vm636_vm13, %v1744_v60, 128 }
 0x14a   : > { %vm678_vm2 = vcmp.lt.s32.totalorder %v646_v9, %v650_v2  ;;  %vm680_vm3 = vcmp.lt.s32.totalorder %v648_v14, %v652_v19  ;;  %vm615_vm4 = vcmp.eq.f32.partialorder %v1617_v16, %v1790_v8  ;;  %vm617_vm5 = vcmp.eq.f32.partialorder %v1629_v25, %v1790_v8 }
 0x14b   : > { %v679_v59 = vsel %vm678_vm2, %v646_v9, %v650_v2  ;;  %v681_v3 = vsel %vm680_vm3, %v648_v14, %v652_v19  ;;  %vm631_vm7 = vcmp.eq.f32.partialorder %v1663_v61, %v1790_v8  ;;  %vm639_vm13 = vcmp.eq.f32.partialorder %v1687_v37, %v1790_v8 }
 0x14c   : > { %vm682_vm8 = vcmp.lt.s32.totalorder %v679_v59, %v654_v11  ;;  %vm684_vm9 = vcmp.lt.s32.totalorder %v681_v3, %v656_v22  ;;  %vm641_vm10 = vcmp.eq.f32.partialorder %v1693_v48, %v1790_v8  ;;  %v670_v32 = vsel %vm638_vm14, %v1747_v62, 128 }
 0x14d   : > { %v683_v10 = vsel %vm682_vm8, %v679_v59, %v654_v11  ;;  %v685_v24 = vsel %vm684_vm9, %v681_v3, %v656_v22  ;;  %vm637_vm9 = vcmp.eq.f32.partialorder %v1681_v28, %v1790_v8  ;;  %v672_v34 = vsel %vm640_vm15, %v1782_v1, 128 }
 0x14e   : > { %vm686_vm2 = vcmp.lt.s32.totalorder %v683_v10, %v658_v12  ;;  %vm688_vm3 = vcmp.lt.s32.totalorder %v685_v24, %v660_v23  ;;  %v674_v9 = vsel %vm642_vm0, %v1785_v6, 128  ;;  %v676_v14 = vsel %vm644_vm1, %v1788_v7, 128 }
 0x14f   : > { %v687_v20 = vsel %vm686_vm2, %v683_v10, %v658_v12  ;;  %v689_v21 = vsel %vm688_vm3, %v685_v24, %v660_v23  ;;  %vm643_vm2 = vcmp.eq.f32.partialorder %v1699_v57, %v1790_v8  ;;  %vm645_vm3 = vcmp.eq.f32.partialorder %v1705_v4, %v1790_v8 }
 0x150   : > { %vm690_vm12 = vcmp.lt.s32.totalorder %v687_v20, %v662_v31  ;;  %vm692_vm11 = vcmp.lt.s32.totalorder %v689_v21, %v664_v38  ;;  %v647_v44 = vsel %vm615_vm4, %v1709_v27, 128  ;;  %v649_v55 = vsel %vm617_vm5, %v1712_v36, 128 }
 0x151   : > { %v691_v29 = vsel %vm690_vm12, %v687_v20, %v662_v31  ;;  %v693_v30 = vsel %vm692_vm11, %v689_v21, %v664_v38  ;;  %vm2104_vm1 = vcmp.eq.f32.partialorder %v1619_v18, %v1790_v8  ;;  %vm2105_vm0 = vcmp.eq.f32.partialorder %v1631_v26, %v1790_v8 }
 0x152   : > { %vm694_vm8 = vcmp.lt.s32.totalorder %v691_v29, %v666_v45  ;;  %vm696_vm6 = vcmp.lt.s32.totalorder %v693_v30, %v668_v52  ;;  %v651_v0 = vsel %vm2104_vm1, %v1715_v39, 128  ;;  %v653_v56 = vsel %vm2105_vm0, %v1718_v42, 128 }
 0x153   : > { %v695_v41 = vsel %vm694_vm8, %v691_v29, %v666_v45  ;;  %v697_v63 = vsel %vm696_vm6, %v693_v30, %v668_v52  ;;  %vm2106_vm5 = vcmp.eq.f32.partialorder %v1639_v33, %v1790_v8  ;;  %vm717_vm6 = vcmp.lt.s32.totalorder %v647_v44, %v651_v0 }
 0x154   : > { %vm698_vm11 = vcmp.lt.s32.totalorder %v695_v41, %v670_v32  ;;  %vm700_vm12 = vcmp.lt.s32.totalorder %v697_v63, %v672_v34  ;;  %v655_v25 = vsel %vm2106_vm5, %v1721_v43, 128  ;;  %vm719_vm8 = vcmp.lt.s32.totalorder %v649_v55, %v653_v56 }
 0x155   : > { %v699_v35 = vsel %vm698_vm11, %v695_v41, %v670_v32  ;;  %v701_v2 = vsel %vm700_vm12, %v697_v63, %v672_v34  ;;  %vm2107_vm11 = vcmp.eq.f32.partialorder %v1645_v40, %v1790_v8  ;;  %v718_v12 = vsel %vm717_vm6, %v647_v44, %v651_v0 }
 0x156   : > { %vm702_vm14 = vcmp.lt.s32.totalorder %v699_v35, %v674_v9  ;;  %vm704_vm15 = vcmp.lt.s32.totalorder %v701_v2, %v676_v14  ;;  %v657_v18 = vsel %vm2107_vm11, %v1724_v46, 128  ;;  %v720_v26 = vsel %vm719_vm8, %v649_v55, %v653_v56 }
 0x157   : > { %v703_v19 = vsel %vm702_vm14, %v699_v35, %v674_v9  ;;  %v705_v16 = vsel %vm704_vm15, %v701_v2, %v676_v14  ;;  %vm2108_vm12 = vcmp.eq.f32.partialorder %v1651_v47, %v1790_v8  ;;  %vm721_vm14 = vcmp.lt.s32.totalorder %v718_v12, %v655_v25 }
 0x158   : > { %vm706_vm4 = vcmp.lt.s32.totalorder %v703_v19, %v705_v16  ;;  %v659_v23 = vsel %vm2108_vm12, %v1727_v49, 128  ;;  %vm723_vm15 = vcmp.lt.s32.totalorder %v720_v26, %v657_v18  ;;  %vm2109_vm0 = vcmp.eq.f32.partialorder %v1657_v54, %v1790_v8 }
 0x159   : > { %v707_v11 = vsel %vm706_vm4, %v703_v19, %v705_v16  ;;  %v661_v33 = vsel %vm2109_vm0, %v1730_v50, 128  ;;  %v722_v31 = vsel %vm721_vm14, %v718_v12, %v655_v25  ;;  %v724_v38 = vsel %vm723_vm15, %v720_v26, %v657_v18 }
 0x15a   : > { %v708_v22 = vrot.slane %v707_v11, 4  ;;  %vm725_vm4 = vcmp.lt.s32.totalorder %v722_v31, %v659_v23  ;;  %vm727_vm5 = vcmp.lt.s32.totalorder %v724_v38, %v661_v33  ;;  %v663_v40 = vsel %vm631_vm7, %v1733_v51, 128 }
 0x15b   : > { %vm2110_vm6 = vcmp.eq.f32.partialorder %v1669_v5, %v1790_v8  ;;  %v726_v52 = vsel %vm725_vm4, %v722_v31, %v659_v23  ;;  %v728_v59 = vsel %vm727_vm5, %v724_v38, %v661_v33  ;;  %vm2111_vm8 = vcmp.eq.f32.partialorder %v1675_v17, %v1790_v8 }
 0x15c   : > { %vm709_vm1 = vcmp.lt.s32.totalorder %v707_v11, %v708_v22  ;;  %v665_v47 = vsel %vm2110_vm6, %v1736_v53, 128  ;;  %v667_v54 = vsel %vm2111_vm8, %v1741_v58, 128  ;;  %vm729_vm11 = vcmp.lt.s32.totalorder %v726_v52, %v663_v40 }
 0x15d   : > { %v710_v45 = vsel %vm709_vm1, %v707_v11, %v708_v22  ;;  %vm731_vm12 = vcmp.lt.s32.totalorder %v728_v59, %v665_v47  ;;  %v669_v61 = vsel %vm637_vm9, %v1744_v60, 128  ;;  %v730_v10 = vsel %vm729_vm11, %v726_v52, %v663_v40 }
 0x15e   : > { %v711_v3 = vrot.slane %v710_v45, 2  ;;  %v732_v24 = vsel %vm731_vm12, %v728_v59, %v665_v47  ;;  %vm733_vm7 = vcmp.lt.s32.totalorder %v730_v10, %v667_v54  ;;  %v671_v5 = vsel %vm639_vm13, %v1747_v62, 128 }
 0x15f   : > { %vm735_vm14 = vcmp.lt.s32.totalorder %v732_v24, %v669_v61  ;;  %v673_v17 = vsel %vm641_vm10, %v1782_v1, 128  ;;  %v734_v20 = vsel %vm733_vm7, %v730_v10, %v667_v54  ;;  %v675_v28 = vsel %vm643_vm2, %v1785_v6, 128 }
 0x160   : > { %v736_v21 = vsel %vm735_vm14, %v732_v24, %v669_v61  ;;  %vm737_vm9 = vcmp.lt.s32.totalorder %v734_v20, %v671_v5  ;;  %vm712_vm1 = vcmp.lt.s32.totalorder %v710_v45, %v711_v3  ;;  %v677_v37 = vsel %vm645_vm3, %v1788_v7, 128 }
 0x161   : > { %vm739_vm15 = vcmp.lt.s32.totalorder %v736_v21, %v673_v17  ;;  %v738_v29 = vsel %vm737_vm9, %v734_v20, %v671_v5  ;;  %v713_v34 = vsel %vm712_vm1, %v710_v45, %v711_v3  ;;  %v1418_v44 = vmov 1.0|1.0  }
 0x162   : > { %v740_v30 = vsel %vm739_vm15, %v736_v21, %v673_v17  ;;  %vm741_vm13 = vcmp.lt.s32.totalorder %v738_v29, %v675_v28  ;;  %v714_v57 = vrot.slane %v713_v34, 1 }
 0x163   : > { %vm743_vm0 = vcmp.lt.s32.totalorder %v740_v30, %v677_v37  ;;  %v742_v48 = vsel %vm741_vm13, %v738_v29, %v675_v28 }
 0x164   : > { %v744_v32 = vsel %vm743_vm0, %v740_v30, %v677_v37  ;;  %vm715_vm4 = vcmp.lt.s32.totalorder %v713_v34, %v714_v57 }
 0x165   : > { %vm745_vm10 = vcmp.lt.s32.totalorder %v742_v48, %v744_v32  ;;  %v1952_v2 = vsel %vm715_vm4, %v713_v34, %v714_v57 }
 0x166   : > { %v746_v41 = vsel %vm745_vm10, %v742_v48, %v744_v32  ;;  %vm756_vm6 = vcmp.eq.s32.totalorder %v1709_v27, %v1952_v2  ;;  %vm758_vm8 = vcmp.eq.s32.totalorder %v1712_v36, %v1952_v2  ;;  %vm760_vm13 = vcmp.eq.s32.totalorder %v1715_v39, %v1952_v2 }
 0x167   : > { %v747_v63 = vrot.slane %v746_v41, 4  ;;  %vm1210_vm15 = vmpackc.low %vm758_vm8, %vm756_vm6  ;;  %vm762_vm0 = vcmp.eq.s32.totalorder %v1718_v42, %v1952_v2  ;;  %vm766_vm6 = vcmp.eq.s32.totalorder %v1724_v46, %v1952_v2 }
 0x168   : > { %vm1214_vm4 = vmpackc.low %vm762_vm0, %vm760_vm13 }
 0x169   : > { %vm748_vm2 = vcmp.lt.s32.totalorder %v746_v41, %v747_v63 }
 0x16a   : > { %v749_v9 = vsel %vm748_vm2, %v746_v41, %v747_v63 }
 0x16b   : > { %v750_v14 = vrot.slane %v749_v9, 2 }
 0x16d   : > { %vm751_vm5 = vcmp.lt.s32.totalorder %v749_v9, %v750_v14 }
 0x16e   : > { %v752_v35 = vsel %vm751_vm5, %v749_v9, %v750_v14 }
 0x16f   : > { %v753_v4 = vrot.slane %v752_v35, 1 }
 0x171   : > { %vm754_vm3 = vcmp.lt.s32.totalorder %v752_v35, %v753_v4 }
 0x172   : > { %v755_v8 = vsel %vm754_vm3, %v752_v35, %v753_v4  ;;  %vm764_vm3 = vcmp.eq.s32.totalorder %v1721_v43, %v1952_v2 }
 0x173   : > { %vm757_vm11 = vcmp.eq.s32.totalorder %v1709_v27, %v755_v8  ;;  %vm759_vm12 = vcmp.eq.s32.totalorder %v1712_v36, %v755_v8  ;;  %vm761_vm7 = vcmp.eq.s32.totalorder %v1715_v39, %v755_v8  ;;  %vm763_vm14 = vcmp.eq.s32.totalorder %v1718_v42, %v755_v8  ;;  %v257_v27 = vld [vmem:[%s2098_s2] sm:$0xf] }
 0x174   : > { %vm1208_vm9 = vmpackc.low %vm759_vm12, %vm757_vm11  ;;  %vm765_vm10 = vcmp.eq.s32.totalorder %v1721_v43, %v755_v8  ;;  %vm767_vm2 = vcmp.eq.s32.totalorder %v1724_v46, %v755_v8  ;;  %vm769_vm8 = vcmp.eq.s32.totalorder %v1727_v49, %v755_v8  ;;  %vm771_vm11 = vcmp.eq.s32.totalorder %v1730_v50, %v755_v8 }
 0x175   : > { %1209 = vmatprep.subr.msk.bf16.mxu1 %vm1208_vm9, %v1418_v44  ;;  %vm1212_vm1 = vmpackc.low %vm763_vm14, %vm761_vm7  ;;  %vm768_vm14 = vcmp.eq.s32.totalorder %v1727_v49, %v1952_v2  ;;  %vm770_vm9 = vcmp.eq.s32.totalorder %v1730_v50, %v1952_v2 }
 0x176   : > { %1211 = vmatpush1.bf16.msk.msra.mxu1 %vm1210_vm15, %v1418_v44  ;;  %vm1216_vm5 = vmpackc.low %vm767_vm2, %vm765_vm10  ;;  %vm773_vm15 = vcmp.eq.s32.totalorder %v1733_v51, %v755_v8  ;;  %vm772_vm10 = vcmp.eq.s32.totalorder %v1733_v51, %v1952_v2  ;;  %vm774_vm2 = vcmp.eq.s32.totalorder %v1736_v53, %v1952_v2 }
 0x177   : > { %1213 = vmatprep.subr.msk.bf16.mxu1 %vm1212_vm1, %v1418_v44  ;;  %vm1218_vm12 = vmpackc.low %vm766_vm6, %vm764_vm3  ;;  %vm775_vm1 = vcmp.eq.s32.totalorder %v1736_v53, %v755_v8 }
 0x178   : > { %vm1220_vm7 = vmpackc.low %vm771_vm11, %vm769_vm8  ;;  %vm776_vm8 = vcmp.eq.s32.totalorder %v1741_v58, %v1952_v2  ;;  %vm778_vm11 = vcmp.eq.s32.totalorder %v1744_v60, %v1952_v2 }
 0x179   : > { %vm1222_vm13 = vmpackc.low %vm770_vm9, %vm768_vm14 }
 0x17a   : > { %1215 = vmatpush1.bf16.msk.msra.mxu1 %vm1214_vm4, %v1418_v44  ;;  %vm1224_vm0 = vmpackc.low %vm775_vm1, %vm773_vm15  ;;  %vm777_vm4 = vcmp.eq.s32.totalorder %v1741_v58, %v755_v8  ;;  %vm780_vm15 = vcmp.eq.s32.totalorder %v1747_v62, %v1952_v2  ;;  %vm782_vm1 = vcmp.eq.s32.totalorder %v1782_v1, %v1952_v2 }
 0x17b   : > { %1217 = vmatprep.subr.msk.bf16.mxu1 %vm1216_vm5, %v1418_v44  ;;  %vm779_vm5 = vcmp.eq.s32.totalorder %v1744_v60, %v755_v8  ;;  %vm1226_vm3 = vmpackc.low %vm774_vm2, %vm772_vm10 }
 0x17c   : > { %vm1228_vm6 = vmpackc.low %vm779_vm5, %vm777_vm4  ;;  %vm784_vm4 = vcmp.eq.s32.totalorder %v1785_v6, %v1952_v2  ;;  %vm786_vm5 = vcmp.eq.s32.totalorder %v1788_v7, %v1952_v2 }
 0x17d   : > { %vm1230_vm14 = vmpackc.low %vm778_vm11, %vm776_vm8 }
 0x17e   : > { %1219 = vmatpush1.bf16.msk.msra.mxu1 %vm1218_vm12, %v1418_v44  ;;  %vm781_vm12 = vcmp.eq.s32.totalorder %v1747_v62, %v755_v8  ;;  %vm1234_vm10 = vmpackc.low %vm782_vm1, %vm780_vm15 }
 0x17f   : > { %1221 = vmatprep.subr.msk.bf16.mxu1 %vm1220_vm7, %v1418_v44  ;;  %vm783_vm7 = vcmp.eq.s32.totalorder %v1782_v1, %v755_v8 }
 0x180   : > { %vm1232_vm9 = vmpackc.low %vm783_vm7, %vm781_vm12 }
 0x182   : > { %1223 = vmatpush1.bf16.msk.msra.mxu1 %vm1222_vm13, %v1418_v44  ;;  %vm785_vm13 = vcmp.eq.s32.totalorder %v1785_v6, %v755_v8 }
 0x183   : > { %1225 = vmatprep.subr.msk.bf16.mxu1 %vm1224_vm0, %v1418_v44  ;;  %vm787_vm0 = vcmp.eq.s32.totalorder %v1788_v7, %v755_v8 }
 0x184   : > { %vm1236_vm2 = vmpackc.low %vm787_vm0, %vm785_vm13 }
 0x186   : > { %1227 = vmatpush1.bf16.msk.msra.mxu1 %vm1226_vm3, %v1418_v44  ;;  %vm1238_vm3 = vmpackc.low %vm786_vm5, %vm784_vm4 }
 0x187   : > { %1229 = vmatprep.subr.msk.bf16.mxu1 %vm1228_vm6, %v1418_v44  ;;  %vm2112_vm6 = vcmask 1043456  }
 0x188   : > { %vm2113_vm8 = vmmov %vm2112_vm6 }
 0x18a   : > { %1231 = vmatpush1.bf16.msk.msra.mxu1 %vm1230_vm14, %v1418_v44 }
 0x18b   : > { %1233 = vmatprep.subr.msk.bf16.mxu1 %vm1232_vm9, %v1418_v44 }
 0x18e   : > { %1235 = vmatpush1.bf16.msk.msra.mxu1 %vm1234_vm10, %v1418_v44 }
 0x18f   : > { %1237 = vmatprep.subr.msk.bf16.mxu1 %vm1236_vm2, %v1418_v44 }
 0x192   : > { %1239 = vmatpush1.bf16.msk.msra.mxu1 %vm1238_vm3, %v1418_v44 }
 0x195   : > { %917 = vmatmul.mubr.f32.vlgmr.msra.gmra.mrb[0].mxu1 %v257_v27 }
 0x268   : > { %v918_v36 = vpop.f32.mrb[0].mxu1 }
 0x269   : > { %v938_v39 = vsub.f32 %v918_v36, %v1525_v13  ;;  %v920_v42 = vpop.f32.mrb[1].mxu1 }
 0x26a   : > { %v925_v43 = vcombine.low %v918_v36, %v920_v42  ;;  %v939_v46 = vsub.f32 %v920_v42, %v1530_v15 }
 0x26b   : > { %v946_v49 = vmul.f32 %v938_v39, %v938_v39 }
 0x26c   : > { %927 = vst [vmem:[%s221_s12] sm:$0xff] %v925_v43  ;;  %v947_v50 = vmul.f32 %v939_v46, %v939_v46 }
 0x26d   : > { %v948_v51 = vsel %vm2112_vm6, %v946_v49, 0.0 }
 0x26e   : > { %v949_v53 = vsel %vm2113_vm8, %v947_v50, 0.0 }
 0x26f   : > { %v950_v58 = vadd.f32 %v949_v53, %v948_v51 }
 0x271   : > { %951 = vadd.xlane.f32.xlu0 %v950_v58 }
 0x272   : > { %1318 = shalt.err (!%p1315_p5)
}
 0x273   : > { %s1319_s7 = scalar_lea.hbm %s2021_s22, 128  ;;  %s1323_s12 = scalar_lea.hbm %s2099_s3, 256 }
 0x274   : > { %p1320_p6 = scmp.ne.s32.totalorder %s2021_s22, %s1319_s7  ;;  %p1324_p10 = scmp.lt.u32.totalorder %s2021_s22, %s2099_s3 }
 0x275   : > { %p1325_p11 = scmp.lt.u32.totalorder %s1323_s12, %s1319_s7  ;;  %p1327_p13 = scmp.lt.u32.totalorder %s1319_s7, %s2021_s22 }
 0x276   : > { %p1321_p7 = pnand %p1320_p6, %p1486_p4 }
 0x277   : > { %p1326_p12 = por %p1325_p11, %p1324_p10 }
 0x278   : > { %p1322_p9 = pneg %p1321_p7 }
 0x279   : > { %p1328_p0 = por %p1327_p13, %p1326_p12 }
 0x27b   : > { %p1329_p1 = pnand %p1328_p0, %p1322_p9 }
 0x27d   : > { %1332 = shalt.err (!%p1329_p1)
}
 0x27e   : > { %1242 = dma.vmem_to_hbm [thread:$0]  (%p1486_p4), %s986_s24, 128, %s2021_s22, %s964_s26  }
 0x27f   : > { %s228_s29 = scalar_lea.vmem [#allocation4], %s1113_s11  ;;  %s2050_s26 = scalar_lea.hbm %s2100_s4, %s1207_s13 }
 0x280   : > { %s999_s30 = sshll.u32 %s228_s29, 4  ;;  %s969_s6 = scalar_lea.sflag [#allocation5], %s2006_s10  ;;  %s2043_s30 = int_to_ptr.vmem [resolvable:$true] %s999_s30 }
 0x281   : > { %s1333_s7 = scalar_lea.vmem %s2043_s30, 128  ;;  %s1420_s11 = smov [#allocation4]  }
 0x282   : > { %p1334_p2 = scmp.ne.s32.totalorder %s2043_s30, %s1333_s7  ;;  %s1337_s8 = sshll.u32 %s1420_s11, 4  ;;  %s1338_s8 = int_to_ptr.vmem [resolvable:$false] %s1337_s8 }
 0x283   : > { %s1339_s9 = scalar_lea.vmem %s1338_s8, 256  ;;  %p1340_p6 = scmp.lt.s32.totalorder %s2043_s30, %s1338_s8 }
 0x284   : > { %p1335_p3 = pnand %p1334_p2, %p1486_p4  ;;  %p1341_p7 = scmp.lt.s32.totalorder %s1339_s9, %s1333_s7 }
 0x286   : > { %p1336_p5 = pneg %p1335_p3  ;;  %p1342_p9 = por %p1341_p7, %p1340_p6 }
 0x288   : > { %p1343_p10 = pnand %p1342_p9, %p1336_p5 }
 0x2fe   : > { %v952_v13 = vpop.xlane.xlu0 %951 }
 0x2ff   : > { %v953_v15 = vrot.slane %v952_v13, 4 }
 0x301   : > { %v954_v60 = vadd.f32 %v953_v15, %v952_v13 }
 0x303   : > { %v955_v62 = vrot.slane %v954_v60, 2 }
 0x305   : > { %v956_v1 = vadd.f32 %v955_v62, %v954_v60 }
 0x307   : > { %v957_v6 = vrot.slane %v956_v1, 1 }
 0x309   : > { %v958_v7 = vadd.f32 %v957_v6, %v956_v1 }
 0x30b   : > { %1240 = vpush %v958_v7 }
 0x33c   : > { %s1241_s5 = spop %1240 }
 0x33d   : > { %v960_v55 = vstv %s1241_s5 }
 0x33e   : > { %962 = vst [vmem:[%s228_s29] sm:$0xff] %v960_v55 }
 0x33f   : > { %1346 = shalt.err (!%p1343_p10)
}
 0x340   : > { %s1347_s18 = scalar_lea.hbm %s2050_s26, 128  ;;  %s1351_s12 = scalar_lea.hbm %s2100_s4, 256 }
 0x341   : > { %p1348_p11 = scmp.ne.s32.totalorder %s2050_s26, %s1347_s18  ;;  %p1352_p0 = scmp.lt.u32.totalorder %s2050_s26, %s2100_s4 }
 0x342   : > { %p1353_p1 = scmp.lt.u32.totalorder %s1351_s12, %s1347_s18  ;;  %p1355_p3 = scmp.lt.u32.totalorder %s1347_s18, %s2050_s26 }
 0x343   : > { %p1349_p12 = pnand %p1348_p11, %p1486_p4 }
 0x344   : > { %p1354_p2 = por %p1353_p1, %p1352_p0 }
 0x345   : > { %p1350_p13 = pneg %p1349_p12 }
 0x346   : > { %p1356_p5 = por %p1355_p3, %p1354_p2 }
 0x348   : > { %p1357_p6 = pnand %p1356_p5, %p1350_p13 }
 0x34a   : > { %1360 = shalt.err (!%p1357_p6)
}
 0x34b   : > { %1243 = dma.vmem_to_hbm [thread:$0]  (%p1486_p4), %s2043_s30, 128, %s2050_s26, %s969_s6  }
 0x34c PF: > { %p1253_p7 = scmp.ge.s32.totalorder %s1415_s20, 2  ;;  %s1011_s29 = sand.u32 1, %s1395_s15  }
 0x34d   : > { %s1012_s5 = scalar_lea.sflag [#allocation3], %s1011_s29 }
 0x34e   : > { %p1247_p9 = pnand %p1253_p7, %p1493_p8 }
 0x350   : > { %1386 = dma.done.wait (!%p1247_p9), %s1012_s5, 128  }
 0x351   : > { %1388 = vsyncadd (!%p1247_p9), %s1012_s5, 4294967168  ;;  %s1021_s22 = scalar_lea.sflag [#allocation5], %s1011_s29 }
 0x352   : > { %1390 = dma.done.wait (!%p1247_p9), %s1021_s22, 128  }
 0x353   : > { %1392 = vsyncadd (!%p1247_p9), %s1021_s22, 4294967168  ;;  %s21_s20 = sadd.s32 1, %s1415_s20   ;;  %s2114_s15 = smov %s1399_s16 }
 0x354   : > { %p18_p10 = scmp.ge.s32.totalorder %s21_s20, 4   ;;  %s2115_s16 = smov %s1403_s17 }
 0x355   : > { %s2116_s17 = smov %s1499_s28  ;;  %s2117_s18 = smov %s1411_s19 }
 0x356   : > { %s2118_s19 = smov %s2120_s23  ;;  %20 = sbr.rel (!%p18_p10) target bundleno = 6 (0x6), region = 84 }
 0x35d   :  { %1026 = vsyncpa [#allocation3], 1 }
 0x35e   :  { %1028 = vsyncpa [#allocation3 + $0x1], 1 }
 0x35f   :  { %1029 = vsyncpa [#allocation5], 1 }
 0x360   :  { %1031 = vsyncpa [#allocation5 + $0x1], 1 }

</bundles_post_ra>
